<compile_context>
chip_gen: v7x
topology: tpu7x:2x2x1
jax: 0.10.0
libtpu: 0.0.40
codegen_flags: <defaults>
</compile_context>

<pallas_src>
import functools
import math

import jax
import jax.numpy as jnp
from jax.experimental import pallas as pl
from jax.experimental.pallas import tpu as pltpu


# ------------------------------ in-kernel helpers ---------------------------

def _layernorm(x, gamma, beta, eps=1e-5):
    mean = jnp.mean(x, axis=-1, keepdims=True)
    var = jnp.mean(jnp.square(x - mean), axis=-1, keepdims=True)
    return (x - mean) * jax.lax.rsqrt(var + eps) * gamma + beta


def _gelu_tanh(x, tanh_dtype=jnp.float32):
    # GELU (tanh approximation). The tanh itself (EUP) may run in bf16 on
    # v6e/v7x; polynomial, scaling and the surrounding math stay f32.
    c = math.sqrt(2.0 / math.pi)
    u = (c * (x + 0.044715 * x * x * x)).astype(tanh_dtype)
    return 0.5 * x * (1.0 + jnp.tanh(u).astype(jnp.float32))


def _pick_tile(T, pref):
    """Largest tile <= pref that divides T and is a multiple of 8 (else whole T)."""
    cand = min(pref, T)
    while cand > 8 and T % cand != 0:
        cand -= 8
    return cand if (T % cand == 0) else T


def _vmem_limit_bytes():
    """~75% of per-core VMEM: ~48 MiB on v7x (64 MiB/TC), ~96 MiB on v5e/v6e (128 MiB)."""
    try:
        cap = pltpu.get_tpu_info().vmem_capacity_bytes
    except Exception:
        cap = 64 * 1024 * 1024          # conservative fallback (v7x-sized)
    return int(min(cap * 3 // 4, 96 * 1024 * 1024))


# ------------------------------ kernel 1: ln1 + QKV --------------------------

def ln_qkv_kernel(x_ref, g_ref, b_ref, w_ref, bias_ref, o_ref):
    x = x_ref[0]                                           # (TT, C) f32
    h = _layernorm(x, g_ref[...], b_ref[...])
    qkv = jnp.dot(h.astype(jnp.bfloat16), w_ref[...],      # bf16 operands, f32 accum
                  preferred_element_type=jnp.float32) + bias_ref[...]
    o_ref[0] = qkv.astype(o_ref.dtype)


# ------------------------------ kernel 2: flash attention --------------------

def flash_attn_kernel(q_ref, k_ref, v_ref, o_ref, m_sc, l_sc, acc_sc, *, exp_dtype):
    _, H, TQ, D = q_ref.shape
    TK = k_ref.shape[2]
    scale = 1.0 / math.sqrt(D)
    qi = pl.program_id(1)
    ki = pl.program_id(2)

    @pl.when(ki == 0)
    def _init():
        m_sc[...] = jnp.full(m_sc.shape, -jnp.inf, m_sc.dtype)
        l_sc[...] = jnp.zeros(l_sc.shape, l_sc.dtype)
        acc_sc[...] = jnp.zeros(acc_sc.shape, acc_sc.dtype)

    # Tile classification. The K/V BlockSpec index_map is clamped in the wrapper,
    # so "outside" tiles also skip their HBM->VMEM DMA (not just the compute).
    inside = ki * TK <= (qi + 1) * TQ - 1           # not entirely in the causal future
    on_diag = ki * TK + TK - 1 > qi * TQ            # straddles the diagonal -> needs mask

    def _scores():
        q = (q_ref[0] * scale).astype(jnp.bfloat16)         # fold 1/sqrt(D) into q (H,TQ,D)
        k = k_ref[0].astype(jnp.bfloat16)                    # (H, TK, D)
        # One head-batched contraction; k-transpose folded into the dot.
        return jnp.einsum('hqd,hkd->hqk', q, k,
                          preferred_element_type=jnp.float32)   # (H, TQ, TK) f32

    def _update(s):
        # Online-softmax update; m/l/acc accumulate in f32.
        m_prev = m_sc[...]                                   # (H, TQ, 1)
        m_new = jnp.maximum(m_prev, jnp.max(s, axis=-1, keepdims=True))
        alpha = jnp.exp(m_prev - m_new)                      # small, f32
        # exp in bf16 on v6e/v7x (attention is EUP-bound there); the f32 cast for
        # the row-sum is VPU filler that co-issues under the EUP-bound exp.
        p = jnp.exp((s - m_new).astype(exp_dtype))
        l_sc[...] = alpha * l_sc[...] + jnp.sum(p.astype(jnp.float32),
                                                axis=-1, keepdims=True)
        acc_sc[...] = alpha * acc_sc[...] + jnp.einsum(
            'hqk,hkd->hqd', p.astype(jnp.bfloat16), v_ref[0],
            preferred_element_type=jnp.float32)
        m_sc[...] = m_new

    # Interior (fully causal-visible) tiles: no iota / mask / select built at all.
    @pl.when(jnp.logical_and(inside, jnp.logical_not(on_diag)))
    def _interior():
        _update(_scores())

    # Diagonal-straddling tiles: build and apply the causal mask.
    @pl.when(jnp.logical_and(inside, on_diag))
    def _diag():
        s = _scores()
        rows = qi * TQ + jax.lax.broadcasted_iota(jnp.int32, (TQ, TK), 0)
        cols = ki * TK + jax.lax.broadcasted_iota(jnp.int32, (TQ, TK), 1)
        _update(jnp.where((rows >= cols)[None, :, :], s, -1e30))

    @pl.when(ki == pl.num_programs(2) - 1)
    def _finalize():
        inv_l = pl.reciprocal(l_sc[...], approx=True)        # EUP slot, off the VPU path
        out = (acc_sc[...] * inv_l).astype(o_ref.dtype)      # (H, TQ, D)
        # Head-merge in VMEM -> one lane-dense (TQ, C) store (no masked D<128 stores,
        # no wrapper-side merge transpose over HBM).
        o_ref[0] = jnp.concatenate([out[h] for h in range(H)], axis=-1)


# ------------------------------ kernel 3: proj + residual + MLP --------------

def proj_mlp_kernel(x_ref, y_ref, wpr_ref, bpr_ref, g2_ref, b2_ref,
                    wfc_ref, bfc_ref, wp2_ref, bp2_ref, o_ref, *, tanh_dtype):
    x = x_ref[0]                                           # (TT, C) f32
    y = y_ref[0].astype(jnp.bfloat16)                      # (TT, C) attention output
    att = jnp.dot(y, wpr_ref[...],
                  preferred_element_type=jnp.float32) + bpr_ref[...]
    x1 = x + att                                           # first residual (f32)

    h = _layernorm(x1, g2_ref[...], b2_ref[...])
    h = jnp.dot(h.astype(jnp.bfloat16), wfc_ref[...],
                preferred_element_type=jnp.float32) + bfc_ref[...]
    h = _gelu_tanh(h, tanh_dtype)
    h = jnp.dot(h.astype(jnp.bfloat16), wp2_ref[...],
                preferred_element_type=jnp.float32) + bp2_ref[...]
    o_ref[0] = (x1 + h).astype(o_ref.dtype)                # second residual
    # TODO(synk): for C >= 1024 (GPT-2 medium/large/XL) tile the MLP hidden dim
    # (stream wfc column-blocks / wp2 row-blocks over an extra reduction grid axis)
    # and single-buffer the resident weights (pipeline_mode=pl.Buffered(1)) so the
    # block still fits v7x's 64 MiB VMEM.


# ------------------------------ wrapper ---------------------------------------

def gpt2_block(x, params, n_head, *, seq_tile=256, q_tile=256, kv_tile=256,
               eup_bf16=True):
    """GPT-2 Block forward.

    Tile defaults target v6e/v7x (256-deep MXU). On v5e prefer kv_tile=128,
    seq_tile=512 and eup_bf16=False (v5e EUP has no bf16 path).
    """
    B, T, C = x.shape
    H = n_head
    D = C // H
    p = params
    bf16 = jnp.bfloat16

    # Stream all matmul weights as bf16 (MXU operands; halves DMA + resident VMEM).
    wqkv = p['wqkv'].astype(bf16)
    wpr = p['wpr'].astype(bf16)
    wfc = p['wfc'].astype(bf16)
    wp2 = p['wp2'].astype(bf16)

    tt = _pick_tile(T, seq_tile)
    tq = _pick_tile(T, q_tile)
    tk = _pick_tile(T, kv_tile)
    nt, nq, nk = T // tt, T // tq, T // tk

    vmem_limit = _vmem_limit_bytes()
    eup_dtype = bf16 if eup_bf16 else jnp.float32

    def full_spec(arr):
        zeros = (0,) * arr.ndim
        return pl.BlockSpec(arr.shape, lambda *_: zeros)

    # ---- kernel 1: ln1 + fused QKV projection -> (B, T, 3C) bf16 ----
    qkv = pl.pallas_call(
        ln_qkv_kernel,
        out_shape=jax.ShapeDtypeStruct((B, T, 3 * C), bf16),
        grid=(B, nt),
        in_specs=[
            pl.BlockSpec((1, tt, C), lambda b, t: (b, t, 0)),
            full_spec(p['ln1_g']), full_spec(p['ln1_b']),
            full_spec(wqkv), full_spec(p['bqkv']),
        ],
        out_specs=pl.BlockSpec((1, tt, 3 * C), lambda b, t: (b, t, 0)),
        compiler_params=pltpu.CompilerParams(
            dimension_semantics=("parallel", "parallel"),
            vmem_limit_bytes=vmem_limit),
        cost_estimate=pl.CostEstimate(
            flops=2 * B * T * C * 3 * C,
            transcendentals=0,
            bytes_accessed=x.size * 4 + wqkv.size * 2 + B * T * 3 * C * 2),
    )(x, p['ln1_g'], p['ln1_b'], wqkv, p['bqkv'])

    # Head split (B,T,C)->(B,H,T,D) is wrapper-side layout plumbing (XLA transposes).
    # (Head *merge* is done lane-dense inside kernel 2, so there is no output-side pass.)
    q, k, v = jnp.split(qkv, 3, axis=-1)

    def to_heads(z):
        return z.reshape(B, T, H, D).transpose(0, 2, 1, 3)   # (B, H, T, D)

    q, k, v = to_heads(q), to_heads(k), to_heads(v)

    # Clamp the K/V block index to the last causally-visible tile so that skipped
    # (future) KV tiles repeat the previous index and the pipeline elides their DMA.
    def kv_index(b, qi, ki):
        kmax = ((qi + 1) * tq - 1) // tk
        return (b, 0, jnp.minimum(ki, kmax), 0)

    # ---- kernel 2: causal flash attention, all heads batched; output (B,T,C) ----
    y = pl.pallas_call(
        functools.partial(flash_attn_kernel, exp_dtype=eup_dtype),
        out_shape=jax.ShapeDtypeStruct((B, T, C), bf16),
        grid=(B, nq, nk),
        in_specs=[
            pl.BlockSpec((1, H, tq, D), lambda b, qi, ki: (b, 0, qi, 0)),
            pl.BlockSpec((1, H, tk, D), kv_index),
            pl.BlockSpec((1, H, tk, D), kv_index),
        ],
        out_specs=pl.BlockSpec((1, tq, C), lambda b, qi, ki: (b, qi, 0)),
        scratch_shapes=[
            pltpu.VMEM((H, tq, 1), jnp.float32),   # running max
            pltpu.VMEM((H, tq, 1), jnp.float32),   # running denom
            pltpu.VMEM((H, tq, D), jnp.float32),   # output accumulator
        ],
        compiler_params=pltpu.CompilerParams(
            dimension_semantics=("parallel", "parallel", "arbitrary"),
            vmem_limit_bytes=vmem_limit),
        cost_estimate=pl.CostEstimate(
            flops=2 * B * H * T * T * D,                  # ~causal half of the dense 4*B*H*T*T*D
            transcendentals=B * H * T * T // 2,
            # q read + out write + K/V re-read across q tiles (causal clamp -> ~nq/2 each)
            bytes_accessed=B * H * T * D * 2 * (2 + nq)),
    )(q, k, v)

    # ---- kernel 3: out-proj + residual + ln2 + MLP + residual ----
    out = pl.pallas_call(
        functools.partial(proj_mlp_kernel, tanh_dtype=eup_dtype),
        out_shape=jax.ShapeDtypeStruct((B, T, C), x.dtype),
        grid=(B, nt),
        in_specs=[
            pl.BlockSpec((1, tt, C), lambda b, t: (b, t, 0)),
            pl.BlockSpec((1, tt, C), lambda b, t: (b, t, 0)),
            full_spec(wpr), full_spec(p['bpr']),
            full_spec(p['ln2_g']), full_spec(p['ln2_b']),
            full_spec(wfc), full_spec(p['bfc']),
            full_spec(wp2), full_spec(p['bp2']),
        ],
        out_specs=pl.BlockSpec((1, tt, C), lambda b, t: (b, t, 0)),
        compiler_params=pltpu.CompilerParams(
            dimension_semantics=("parallel", "parallel"),
            vmem_limit_bytes=vmem_limit),
        cost_estimate=pl.CostEstimate(
            flops=2 * B * T * (C * C + 8 * C * C),
            transcendentals=B * T * 4 * C,
            bytes_accessed=(3 * B * T * C * 4 + B * T * C * 2
                            + (wpr.size + wfc.size + wp2.size) * 2)),
    )(x, y, wpr, p['bpr'], p['ln2_g'], p['ln2_b'], wfc, p['bfc'], wp2, p['bp2'])
    return out


# ------------------------------ pure-JAX reference ----------------------------

def reference_block(x, p, n_head):
    """Pure-JAX f32 reference matching the PyTorch Block forward."""
    def ln(z, g, b):
        m = z.mean(-1, keepdims=True)
        v = ((z - m) ** 2).mean(-1, keepdims=True)
        return (z - m) / jnp.sqrt(v + 1e-5) * g + b

    B, T, C = x.shape
    D = C // n_head
    h = ln(x, p['ln1_g'][0], p['ln1_b'][0])
    qkv = h @ p['wqkv'] + p['bqkv'][0]
    q, k, v = jnp.split(qkv, 3, axis=-1)
    q = q.reshape(B, T, n_head, D).transpose(0, 2, 1, 3)
    k = k.reshape(B, T, n_head, D).transpose(0, 2, 1, 3)
    v = v.reshape(B, T, n_head, D).transpose(0, 2, 1, 3)
    att = (q @ jnp.swapaxes(k, -1, -2)) / math.sqrt(D)
    mask = jnp.tril(jnp.ones((T, T), bool))
    att = jnp.where(mask, att, -1e30)
    att = jax.nn.softmax(att, axis=-1)
    y = (att @ v).transpose(0, 2, 1, 3).reshape(B, T, C)
    y = y @ p['wpr'] + p['bpr'][0]
    x1 = x + y
    h2 = ln(x1, p['ln2_g'][0], p['ln2_b'][0])
    h2 = h2 @ p['wfc'] + p['bfc'][0]
    c = math.sqrt(2.0 / math.pi)
    h2 = 0.5 * h2 * (1.0 + jnp.tanh(c * (h2 + 0.044715 * h2 ** 3)))
    h2 = h2 @ p['wp2'] + p['bp2'][0]
    return x1 + h2


if __name__ == "__main__":
    # Small config consistent with GPTConfig: n_embd=32, n_head=4, seq=8, batch=2.
    B, T, C, H = 2, 8, 32, 4
    key = jax.random.PRNGKey(0)
    ks = jax.random.split(key, 10)
    std = 0.02
    params = {
        'ln1_g': jnp.ones((1, C), jnp.float32),
        'ln1_b': jnp.zeros((1, C), jnp.float32),
        'wqkv': std * jax.random.normal(ks[0], (C, 3 * C), jnp.float32),
        'bqkv': std * jax.random.normal(ks[1], (1, 3 * C), jnp.float32),
        'wpr':  std * jax.random.normal(ks[2], (C, C), jnp.float32),
        'bpr':  std * jax.random.normal(ks[3], (1, C), jnp.float32),
        'ln2_g': jnp.ones((1, C), jnp.float32),
        'ln2_b': jnp.zeros((1, C), jnp.float32),
        'wfc':  std * jax.random.normal(ks[4], (C, 4 * C), jnp.float32),
        'bfc':  std * jax.random.normal(ks[5], (1, 4 * C), jnp.float32),
        'wp2':  std * jax.random.normal(ks[6], (4 * C, C), jnp.float32),
        'bp2':  std * jax.random.normal(ks[7], (1, C), jnp.float32),
    }
    x = jax.random.normal(ks[8], (B, T, C), jnp.float32)

    out = gpt2_block(x, params, H)
    jax.block_until_ready(out)

    ref = reference_block(x, params, H)
    max_err = float(jnp.max(jnp.abs(out.astype(jnp.float32) - ref)))
    # bf16 MXU operands + bf16 exp + approx reciprocal => relaxed tolerance vs f32 reference.
    assert jnp.allclose(out.astype(jnp.float32), ref, atol=2e-2, rtol=2e-2), f"max err {max_err}"
    print("KERNEL_OK")
</pallas_src>

<mosaic_0001>
module attributes {stable_mosaic.version = 11 : i64} {
  func.func @ln_qkv_kernel(%arg0: i32, %arg1: i32, %arg2: memref<1x8x32xf32, #tpu.memory_space<vmem>>, %arg3: memref<1x32xf32, #tpu.memory_space<vmem>>, %arg4: memref<1x32xf32, #tpu.memory_space<vmem>>, %arg5: memref<32x96xbf16, #tpu.memory_space<vmem>>, %arg6: memref<1x96xf32, #tpu.memory_space<vmem>>, %arg7: memref<1x8x96xbf16, #tpu.memory_space<vmem>>) attributes {dimension_semantics = [#tpu.dimension_semantics<parallel>, #tpu.dimension_semantics<parallel>], iteration_bounds = array<i64: 2, 1>, scalar_prefetch = 0 : i64, scratch_operands = 0 : i64, tpu.core_type = #tpu.core_type<tc>, window_params = [{transform_indices = @transform_0, window_bounds = array<i64: 1, 8, 32>}, {pipeline_mode = #tpu.pipeline_mode<synchronous>, transform_indices = @transform_1, window_bounds = array<i64: 1, 32>}, {pipeline_mode = #tpu.pipeline_mode<synchronous>, transform_indices = @transform_2, window_bounds = array<i64: 1, 32>}, {pipeline_mode = #tpu.pipeline_mode<synchronous>, transform_indices = @transform_3, window_bounds = array<i64: 32, 96>}, {pipeline_mode = #tpu.pipeline_mode<synchronous>, transform_indices = @transform_4, window_bounds = array<i64: 1, 96>}, {transform_indices = @transform_5, window_bounds = array<i64: 1, 8, 96>}]} {
    %c0 = arith.constant 0 : index
    %c0_0 = arith.constant 0 : index
    %c0_1 = arith.constant 0 : index
    %0 = vector.load %arg2[%c0, %c0_0, %c0_1] : memref<1x8x32xf32, #tpu.memory_space<vmem>>, vector<1x8x32xf32>
    %1 = vector.shape_cast %0 : vector<1x8x32xf32> to vector<8x32xf32>
    %c0_2 = arith.constant 0 : index
    %c0_3 = arith.constant 0 : index
    %2 = vector.load %arg3[%c0_2, %c0_3] : memref<1x32xf32, #tpu.memory_space<vmem>>, vector<1x32xf32>
    %c0_4 = arith.constant 0 : index
    %c0_5 = arith.constant 0 : index
    %3 = vector.load %arg4[%c0_4, %c0_5] : memref<1x32xf32, #tpu.memory_space<vmem>>, vector<1x32xf32>
    %cst = arith.constant dense<0.000000e+00> : vector<8xf32>
    %4 = vector.multi_reduction <add>, %1, %cst [1] : vector<8x32xf32> to vector<8xf32>
    %5 = vector.shape_cast %4 : vector<8xf32> to vector<8x1xf32>
    %cst_6 = arith.constant 3.200000e+01 : f32
    %6 = vector.broadcast %cst_6 : f32 to vector<8x1xf32>
    %7 = arith.divf %5, %6 : vector<8x1xf32>
    %8 = vector.broadcast %7 : vector<8x1xf32> to vector<8x32xf32>
    %9 = arith.subf %1, %8 : vector<8x32xf32>
    %10 = arith.mulf %9, %9 : vector<8x32xf32>
    %cst_7 = arith.constant dense<0.000000e+00> : vector<8xf32>
    %11 = vector.multi_reduction <add>, %10, %cst_7 [1] : vector<8x32xf32> to vector<8xf32>
    %12 = vector.shape_cast %11 : vector<8xf32> to vector<8x1xf32>
    %cst_8 = arith.constant 3.200000e+01 : f32
    %13 = vector.broadcast %cst_8 : f32 to vector<8x1xf32>
    %14 = arith.divf %12, %13 : vector<8x1xf32>
    %15 = vector.broadcast %7 : vector<8x1xf32> to vector<8x32xf32>
    %16 = arith.subf %1, %15 : vector<8x32xf32>
    %cst_9 = arith.constant 9.99999974E-6 : f32
    %17 = vector.broadcast %cst_9 : f32 to vector<8x1xf32>
    %18 = arith.addf %14, %17 : vector<8x1xf32>
    %19 = math.rsqrt %18 : vector<8x1xf32>
    %20 = vector.broadcast %19 : vector<8x1xf32> to vector<8x32xf32>
    %21 = arith.mulf %16, %20 : vector<8x32xf32>
    %22 = vector.broadcast %2 : vector<1x32xf32> to vector<8x32xf32>
    %23 = arith.mulf %21, %22 : vector<8x32xf32>
    %24 = vector.broadcast %3 : vector<1x32xf32> to vector<8x32xf32>
    %25 = arith.addf %23, %24 : vector<8x32xf32>
    %26 = arith.truncf %25 : vector<8x32xf32> to vector<8x32xbf16>
    %c0_10 = arith.constant 0 : index
    %c0_11 = arith.constant 0 : index
    %27 = vector.load %arg5[%c0_10, %c0_11] : memref<32x96xbf16, #tpu.memory_space<vmem>>, vector<32x96xbf16>
    %cst_12 = arith.constant dense<0.000000e+00> : vector<8x96xf32>
    %28 = tpu.matmul %26, %27, %cst_12 {dimension_numbers = #tpu.dot_dimension_numbers<[1], [0], [0], [1], [0, 0, 1, 1], [], []>} : vector<8x32xbf16>, vector<32x96xbf16>, vector<8x96xf32> -> vector<8x96xf32>
    %c0_13 = arith.constant 0 : index
    %c0_14 = arith.constant 0 : index
    %29 = vector.load %arg6[%c0_13, %c0_14] : memref<1x96xf32, #tpu.memory_space<vmem>>, vector<1x96xf32>
    %30 = vector.broadcast %29 : vector<1x96xf32> to vector<8x96xf32>
    %31 = arith.addf %28, %30 : vector<8x96xf32>
    %32 = arith.truncf %31 : vector<8x96xf32> to vector<8x96xbf16>
    %c0_15 = arith.constant 0 : index
    %c0_16 = arith.constant 0 : index
    %c0_17 = arith.constant 0 : index
    %33 = vector.load %arg7[%c0_15, %c0_16, %c0_17] : memref<1x8x96xbf16, #tpu.memory_space<vmem>>, vector<1x8x96xbf16>
    %34 = vector.shape_cast %33 : vector<1x8x96xbf16> to vector<8x96xbf16>
    %35 = vector.shape_cast %32 : vector<8x96xbf16> to vector<1x8x96xbf16>
    tpu.vector_store %arg7[%c0_15, %c0_16, %c0_17], %35 {strides = array<i32>} : memref<1x8x96xbf16, #tpu.memory_space<vmem>>, vector<1x8x96xbf16>,
    return
  }
  func.func @transform_0(%arg0: i32, %arg1: i32) -> (i32, i32, i32) {
    %c0_i32 = arith.constant 0 : i32
    %c0_i32_0 = arith.constant 0 : i32
    return %arg0, %arg1, %c0_i32 : i32, i32, i32
  }
  func.func @transform_1(%arg0: i32, %arg1: i32) -> (i32, i32) {
    %c0_i32 = arith.constant 0 : i32
    %c0_i32_0 = arith.constant 0 : i32
    %c0_i32_1 = arith.constant 0 : i32
    return %c0_i32, %c0_i32_0 : i32, i32
  }
  func.func @transform_2(%arg0: i32, %arg1: i32) -> (i32, i32) {
    %c0_i32 = arith.constant 0 : i32
    %c0_i32_0 = arith.constant 0 : i32
    %c0_i32_1 = arith.constant 0 : i32
    return %c0_i32, %c0_i32_0 : i32, i32
  }
  func.func @transform_3(%arg0: i32, %arg1: i32) -> (i32, i32) {
    %c0_i32 = arith.constant 0 : i32
    %c0_i32_0 = arith.constant 0 : i32
    %c0_i32_1 = arith.constant 0 : i32
    return %c0_i32, %c0_i32_0 : i32, i32
  }
  func.func @transform_4(%arg0: i32, %arg1: i32) -> (i32, i32) {
    %c0_i32 = arith.constant 0 : i32
    %c0_i32_0 = arith.constant 0 : i32
    %c0_i32_1 = arith.constant 0 : i32
    return %c0_i32, %c0_i32_0 : i32, i32
  }
  func.func @transform_5(%arg0: i32, %arg1: i32) -> (i32, i32, i32) {
    %c0_i32 = arith.constant 0 : i32
    %c0_i32_0 = arith.constant 0 : i32
    return %arg0, %arg1, %c0_i32 : i32, i32, i32
  }
}

</mosaic_0001>

<bundles_post_ra>
// kernel: tpu_custom_call.1
= control target key start
LH: loop header
LB: loop body
LE: loop exit
PB: predicated region body
PF: predicated region fallthrough
CT: control target
= control target key end

     0   :  { %10 = vsyncpa [#allocation3], 0  ;;  %s1003_s0 = inlined_call_operand.hbm [shape: f32[2,8,32], index: 0, kind: input, shape index: {}]   ;;  %s1004_s1 = inlined_call_operand.vmem [shape: f32[1,32], index: 1, kind: input, shape index: {}]   ;;  %s1005_s2 = inlined_call_operand.vmem [shape: f32[1,32], index: 2, kind: input, shape index: {}]   ;;  %s1006_s3 = inlined_call_operand.hbm [shape: bf16[32,96], index: 3, kind: input, shape index: {}]   ;;  %s1007_s4 = inlined_call_operand.vmem [shape: f32[1,96], index: 4, kind: input, shape index: {}]   ;;  %s1008_s5 = inlined_call_operand.hbm [shape: bf16[2,8,96], index: 5, kind: output, shape index: {}]  }
   0x1   :  { %12 = vsyncpa [#allocation3 + $0x1], 0 }
   0x2   :  { %13 = vsyncpa [#allocation6], 0 }
   0x3   :  { %14 = vsyncpa [#allocation4], 0 }
   0x4   :  { %16 = vsyncpa [#allocation4 + $0x1], 0  ;;  %s776_s18 = smov 0   ;;  %s778_s19 = smov 0  }
   0x5   :  { %s780_s20 = smov 0   ;;  %s782_s21 = smov 0  }
   0x6   :  { %s784_s22 = smov 0   ;;  %s786_s23 = smov 0  }
   0x7 LB: > { %s480_s24 = sadd.s32 4294967295, %s737_s23   ;;  %s481_s25 = sadd.s32 4294967294, %s737_s23   ;;  %s737_s23 = sphi %s786_s23, %s22_s23   ;;  %s733_s22 = sphi %s784_s22, %s1032_s22   ;;  %s729_s21 = sphi %s782_s21, %s1031_s21   ;;  %s725_s20 = sphi %s780_s20, %s1030_s20   ;;  %s721_s19 = sphi %s778_s19, %s1029_s19   ;;  %s717_s18 = sphi %s776_s18, %s1028_s18  }
   0x8   : > { %p56_p0 = scmp.ne.s32.totalorder %s721_s19, %s717_s18  ;;  %p810_p1 = scmp.eq.s32.totalorder %s480_s24, 0 }
   0x9   : > { %p814_p2 = scmp.eq.s32.totalorder %s480_s24, 1  ;;  %p172_p3 = scmp.eq.s32.totalorder %s481_s25, 1 }
   0xa   : > { %s1013_s26 = scalar_select %p810_p1, 1, 0 }
   0xb   : > { %s1014_s27 = scalar_select %p814_p2, 1, 0 }
   0xc   : > { %p820_p4 = por %p810_p1, %p56_p0  ;;  %p482_p5 = scmp.ge.s32.totalorder %s737_s23, 1 }
   0xd   : > { %p825_p6 = por %p172_p3, %p56_p0  ;;  %p179_p7 = scmp.lt.s32.totalorder %s737_s23, 3 }
   0xe   : > { %s1015_s28 = scalar_select %p820_p4, 1, 0 }
   0xf   : > { %s1016_s29 = scalar_select %p825_p6, 1, 0 }
  0x10   : > { %p830_p8 = pnand %p482_p5, %p179_p7  ;;  %s739_s6 = smov [#allocation5]  }
  0x11   : > { %s197_s7 = sshll.u32 %s739_s6, 4  ;;  %s34_s9 = sadd.s32 1, %s733_s22  ;;  %s198_s7 = int_to_ptr.vmem [resolvable:$true] %s197_s7 }
  0x12   : > { %s1017_s30 = scalar_select %p830_p8, 1, 0 }
  0x13   : > { %p520_p9 = pneg %p830_p8  ;;  %s593_s12 = scalar_lea.hbm %s1006_s3, 256 }
  0x14   : > { %p594_p12 = scmp.ne.s32.totalorder %s1006_s3, %s593_s12  ;;  %p600_p5 = scmp.lt.u32.totalorder %s593_s12, %s1006_s3 }
  0x15   : > { %p839_p11 = pnand %p520_p9, %p810_p1 }
  0x17   : > { %p595_p13 = pneg %p839_p11 }
  0x19   : > { %p596_p0 = pnand %p595_p13, %p594_p12 }
  0x1b   : > { %p597_p3 = pneg %p596_p0 }
  0x1d   : > { %p602_p7 = pnand %p600_p5, %p597_p3 }
  0x1f   : > { %605 = shalt.err (!%p602_p7)
}
  0x20   : > { %s606_s17 = scalar_lea.vmem %s198_s7, 256  ;;  %p614_p1 = scmp.lt.s32.totalorder %s198_s7, %s198_s7 }
  0x21   : > { %p607_p9 = scmp.ne.s32.totalorder %s198_s7, %s606_s17  ;;  %p615_p4 = scmp.lt.s32.totalorder %s606_s17, %s606_s17 }
  0x23   : > { %p609_p10 = pnand %p607_p9, %p595_p13  ;;  %p616_p8 = por %p615_p4, %p614_p1 }
  0x25   : > { %p610_p6 = pneg %p609_p10 }
  0x27   : > { %p617_p2 = pnand %p616_p8, %p610_p6 }
  0x29   : > { %620 = shalt.err (!%p617_p2)
}
  0x2a   : > { %s740_s24 = smov 64   ;;  %s741_s25 = smov 4  }
  0x2b   : > { %523 = dma.hbm_to_vmem [thread:$0]  (!%p839_p11), %s1006_s3, 256, %s198_s7, [#allocation6], %s740_s24, %s740_s24, %s741_s25  }
  0x2c   : > { %p36_p1 = scmp.ge.s32.totalorder %s34_s9, 2  ;;  %s43_s11 = sadd.s32 1, %s725_s20 }
  0x2d   : > { %p50_p2 = scmp.ne.s32.totalorder %s725_s20, %s721_s19  ;;  %p51_p4 = scmp.eq.s32.totalorder %s737_s23, 0 }
  0x2e   : > { %s1034_s9 = smov (%p36_p1, %s34_s9), 0  ;;  %p1020_p8 = scmp.ne.s32.totalorder %s1014_s27, 0 }
  0x2f   : > { %p866_p6 = por %p51_p4, %p50_p2  ;;  %s38_s8 = ssub.s32 %s733_s22, %s1034_s9 }
  0x30   : > { %p872_p10 = por %p1020_p8, %p50_p2  ;;  %p533_p12 = scmp.lt.s32.totalorder %s737_s23, 2 }
  0x31   : > { %p41_p11 = scmp.eq.s32.totalorder %s38_s8, 0  ;;  %s214_s7 = sand.u32 1, %s725_s20  }
  0x32   : > { %s485_s14 = sshll.u32 %s214_s7, 3  ;;  %s486_s16 = sshll.u32 %s733_s22, 7 }
  0x33   : > { %s881_s15 = scalar_select %p41_p11, %s725_s20, %s43_s11  }
  0x34   : > { %s887_s25 = scalar_lea.hbm %s1003_s0, %s486_s16  ;;  %s218_s27 = scalar_lea.vmem [#allocation2], %s485_s14 }
  0x35   : > { %s226_s6 = sshll.u32 %s218_s27, 4  ;;  %p893_p13 = pnand %p533_p12, %p866_p6  ;;  %s889_s6 = int_to_ptr.vmem [resolvable:$true] %s226_s6 }
  0x36   : > { %s215_s11 = scalar_lea.sflag [#allocation3], %s214_s7  ;;  %s621_s8 = scalar_lea.hbm %s887_s25, 128 }
  0x37   : > { %p622_p0 = scmp.ne.s32.totalorder %s887_s25, %s621_s8  ;;  %p623_p3 = pneg %p893_p13 }
  0x38   : > { %s626_s17 = scalar_lea.hbm %s1003_s0, 256  ;;  %p627_p9 = scmp.lt.u32.totalorder %s887_s25, %s1003_s0 }
  0x39   : > { %p624_p5 = pnand %p623_p3, %p622_p0  ;;  %p628_p1 = scmp.lt.u32.totalorder %s626_s17, %s621_s8 }
  0x3a   : > { %p630_p4 = scmp.lt.u32.totalorder %s621_s8, %s887_s25 }
  0x3b   : > { %p625_p7 = pneg %p624_p5  ;;  %p629_p2 = por %p628_p1, %p627_p9 }
  0x3d   : > { %p631_p6 = por %p630_p4, %p629_p2 }
  0x3f   : > { %p632_p8 = pnand %p631_p6, %p625_p7 }
  0x41   : > { %635 = shalt.err (!%p632_p8)
}
  0x42   : > { %s636_s7 = scalar_lea.vmem %s889_s6, 128  ;;  %s742_s27 = smov [#allocation2]  }
  0x43   : > { %p637_p12 = scmp.ne.s32.totalorder %s889_s6, %s636_s7  ;;  %s641_s14 = sshll.u32 %s742_s27, 4  ;;  %s642_s14 = int_to_ptr.vmem [resolvable:$false] %s641_s14 }
  0x44   : > { %s643_s16 = scalar_lea.vmem %s642_s14, 256  ;;  %p644_p5 = scmp.lt.s32.totalorder %s889_s6, %s642_s14 }
  0x45   : > { %p639_p11 = pnand %p637_p12, %p623_p3  ;;  %p645_p9 = scmp.lt.s32.totalorder %s643_s16, %s636_s7 }
  0x47   : > { %p640_p0 = pneg %p639_p11  ;;  %p646_p1 = por %p645_p9, %p644_p5 }
  0x49   : > { %p647_p2 = pnand %p646_p1, %p640_p0 }
  0x4b   : > { %650 = shalt.err (!%p647_p2)
}
  0x4c   : > { %527 = dma.hbm_to_vmem [thread:$0]  (!%p893_p13), %s887_s25, 128, %s889_s6, %s215_s11  }
  0x4d   : > { %p1023_p7 = scmp.ne.s32.totalorder %s1017_s30, 0 }
  0x4e   : > { %s925_s8 = sand.u32 (!%p1023_p7), 1, %s721_s19   ;;  %p1024_p3 = scmp.ne.s32.totalorder (!%p1023_p7), %s1015_s28, 0 }
  0x4f   : > { %235 = sbr.rel (%p1023_p7) target bundleno = 636 (0x27c), region = 40  ;;  %s488_s17 = sshll.u32 (!%p1023_p7), %s925_s8, 3 }
  0x50   : > { %s238_s12 = scalar_lea.sflag (!%p1023_p7), [#allocation3], %s925_s8  ;;  %s241_s24 = scalar_lea.vmem (!%p1023_p7), [#allocation2], %s488_s17 }
  0x56   : > { %704 = dma.done.wait (%p1024_p3), %s238_s12, 128  }
  0x57   : > { %706 = vsyncadd (%p1024_p3), %s238_s12, 4294967168  ;;  %p1025_p4 = scmp.ne.s32.totalorder %s1013_s26, 0 }
  0x59   : > { %708 = dma.done.wait (%p1025_p4), [#allocation6], 256  }
  0x5a   : > { %710 = vsyncadd (%p1025_p4), [#allocation6], 4294967040  ;;  %vm276_vm0 = vcmask 261120   ;;  %v273_v0 = vld [vmem:[%s241_s24] sm:$0xff]  ;;  %v589_v7 = vld [vmem:[#allocation5] sm:$0xff]   ;;  %v743_v8 = vmov 0.0  }
  0x5b   : > { %v277_v1 = vsel %vm276_vm0, %v273_v0, 0.0  ;;  %504 = vmatprep.subr.bf16.mxu0 %v743_v8  ;;  %v590_v9 = vld [vmem:[#allocation5 + $0x8] sm:$0xff]   ;;  %vm744_vm1 = vmmov 0   ;;  %v491_v14 = vld [vmem:[%s1004_s1] ss:$0 sm:$0xff]  ;;  %s490_s6 = sshll.u32 %s925_s8, 2 }
  0x5c   : > { %278 = vadd.xlane.f32.xlu0 %v277_v1  ;;  %505 = vmatpush3.bf16.msra.mxu0 %v589_v7  ;;  %v492_v16 = vld [vmem:[%s1005_s2] ss:$0 sm:$0xff]  ;;  %s498_s7 = sshll.u32 %s729_s21, 6  ;;  %s271_s27 = scalar_lea.vmem [#allocation7], %s490_s6  ;;  %vm373_vm2 = vcmask 781312  }
  0x5d   : > { %508 = vmatprep.mubr.msk.bf16.mxu0 %vm744_vm1, %v743_v8  ;;  %506 = vmatprep.subr.bf16.mxu0 %v743_v8  ;;  %v493_v20 = vld [vmem:[%s1007_s4] ss:$0 sm:$0xff]  ;;  %s390_s14 = sshll.u32 %s271_s27, 4  ;;  %s954_s12 = scalar_lea.hbm %s1008_s5, %s498_s7  ;;  %s956_s14 = int_to_ptr.vmem [resolvable:$true] %s390_s14 }
  0x5e   : > { %s376_s21 = scalar_lea.sflag [#allocation4], %s925_s8  ;;  %s651_s24 = scalar_lea.vmem %s956_s14, 64 }
  0x5f   : > { %p652_p13 = scmp.ne.s32.totalorder %s956_s14, %s651_s24  ;;  %s745_s26 = smov [#allocation7]  }
  0x60   : > { %507 = vmatpush3.bf16.msra.mxu0 %v590_v9  ;;  %s655_s28 = sshll.u32 %s745_s26, 4  ;;  %s656_s28 = int_to_ptr.vmem [resolvable:$false] %s655_s28 }
  0x61   : > { %p653_p6 = pnand %p652_p13, %p872_p10  ;;  %s657_s30 = scalar_lea.vmem %s656_s28, 128 }
  0x62   : > { %p658_p12 = scmp.lt.s32.totalorder %s956_s14, %s656_s28  ;;  %p659_p11 = scmp.lt.s32.totalorder %s657_s30, %s651_s24 }
  0x63   : > { %p654_p8 = pneg %p653_p6 }
  0x64   : > { %p660_p0 = por %p659_p11, %p658_p12 }
  0x66   : > { %p661_p5 = pnand %p660_p0, %p654_p8 }
  0xe9   : > { %v279_v2 = vpop.xlane.xlu0 %278 }
  0xea   : > { %v281_v3 = vmul.f32 0.03125, %v279_v2 }
  0xec   : > { %v282_v4 = vsub.f32 %v273_v0, %v281_v3 }
  0xee   : > { %v283_v5 = vmul.f32 %v282_v4, %v282_v4 }
  0xf0   : > { %v284_v6 = vsel %vm276_vm0, %v283_v5, 0.0 }
  0xf1   : > { %285 = vadd.xlane.f32.xlu0 %v284_v6 }
 0x17e   : > { %v286_v10 = vpop.xlane.xlu0 %285 }
 0x17f   : > { %v287_v11 = vmul.f32 0.03125, %v286_v10 }
 0x181   : > { %v288_v12 = vadd.f32 1e-05, %v287_v11 }
 0x183   : > { %591 = vrsqrt.f32 %v288_v12 }
 0x18d   : > { %v592_v13 = vpop.eup %591 }
 0x18e   : > { %v290_v15 = vmul.f32 %v592_v13, %v282_v4 }
 0x190   : > { %v297_v17 = vmul.f32 %v491_v14, %v290_v15 }
 0x192   : > { %v304_v18 = vadd.f32 %v492_v16, %v297_v17 }
 0x194   : > { %v305_v19 = vpack.c.bf16 %v304_v18, %v304_v18 }
 0x196   : > { %509 = vmatmul.mubr.msk.bf16.vlgmr.msra.gmra.mrb[0].mxu0 %vm276_vm0, %v305_v19 }
 0x269   : > { %v366_v21 = vpop.f32.mrb[0].mxu0 }
 0x26a   : > { %v367_v22 = vadd.f32 %v493_v20, %v366_v21  ;;  %v510_v23 = vpop.f32.mrb[1].mxu0 }
 0x26b   : > { %v369_v24 = vpop.f32.mrb[2].mxu0 }
 0x26c   : > { %v372_v25 = vpack.c.bf16 %v367_v22, %v367_v22  ;;  %v511_v26 = vpop.f32.mrb[3].mxu0 }
 0x26e   : > { %374 = vst.msk [vmem:[%s271_s27] sm:$0xf] %vm373_vm2, %v372_v25 }
 0x26f   : > { %664 = shalt.err (!%p661_p5)
}
 0x270   : > { %s665_s8 = scalar_lea.hbm %s954_s12, 64  ;;  %s669_s10 = scalar_lea.hbm %s1008_s5, 128 }
 0x271   : > { %p666_p9 = scmp.ne.s32.totalorder %s954_s12, %s665_s8  ;;  %p670_p7 = scmp.lt.u32.totalorder %s954_s12, %s1008_s5 }
 0x272   : > { %p671_p3 = scmp.lt.u32.totalorder %s669_s10, %s665_s8  ;;  %p673_p13 = scmp.lt.u32.totalorder %s665_s8, %s954_s12 }
 0x273   : > { %p667_p1 = pnand %p666_p9, %p872_p10 }
 0x274   : > { %p672_p4 = por %p671_p3, %p670_p7 }
 0x275   : > { %p668_p2 = pneg %p667_p1 }
 0x276   : > { %p674_p6 = por %p673_p13, %p672_p4 }
 0x278   : > { %p675_p8 = pnand %p674_p6, %p668_p2 }
 0x27a   : > { %678 = shalt.err (!%p675_p8)
}
 0x27b   : > { %518 = dma.vmem_to_hbm [thread:$0]  (%p872_p10), %s956_s14, 64, %s954_s12, %s376_s21  }
 0x27c PF: > { %s402_s27 = sand.u32 1, %s717_s18   ;;  %p1026_p12 = scmp.ne.s32.totalorder %s1016_s29, 0 }
 0x27d   : > { %p1027_p11 = scmp.ge.s32.totalorder %s737_s23, 2  ;;  %s403_s16 = scalar_lea.sflag [#allocation4], %s402_s27 }
 0x27f   : > { %p529_p0 = pnand %p1027_p11, %p1026_p12 }
 0x281   : > { %712 = dma.done.wait (!%p529_p0), %s403_s16, 64  }
 0x282   : > { %714 = vsyncadd (!%p529_p0), %s403_s16, 4294967232  ;;  %s22_s23 = sadd.s32 1, %s737_s23   ;;  %s1028_s18 = smov %s721_s19 }
 0x283   : > { %p19_p5 = scmp.ge.s32.totalorder %s22_s23, 4   ;;  %s1029_s19 = smov %s725_s20 }
 0x284   : > { %s1030_s20 = smov %s881_s15  ;;  %s1031_s21 = smov %s733_s22 }
 0x285   : > { %s1032_s22 = smov %s1034_s9  ;;  %21 = sbr.rel (!%p19_p5) target bundleno = 7 (0x7), region = 89 }
 0x28c   :  { %408 = vsyncpa [#allocation3], 1 }
 0x28d   :  { %410 = vsyncpa [#allocation3 + $0x1], 1 }
 0x28e   :  { %411 = vsyncpa [#allocation6], 1 }
 0x28f   :  { %412 = vsyncpa [#allocation4], 1 }
 0x290   :  { %414 = vsyncpa [#allocation4 + $0x1], 1 }

</bundles_post_ra>
